<compile_context>
chip_gen: v7x
topology: tpu7x:2x2x1
jax: 0.10.0
libtpu: 0.0.40
codegen_flags: <defaults>
</compile_context>

<pallas_src>
import functools

import jax
import jax.numpy as jnp
from jax.experimental import pallas as pl
from jax.experimental.pallas import tpu as pltpu


def deepten_head_kernel(x_ref, w1t_ref, b1_ref, scale_ref, shift_ref,
                        w2t_ref, b2_ref,
                        logits_ref, f_ref,
                        max_sc, sum_sc, *, hw_total):
    """One (B-tile, HW-tile) grid step.

    x_ref is a [TB, C, THW] tile (C on sublanes, HW on lanes).  Accumulates the
    per-channel running max / running sum over the HW (reduction) grid axis in
    [TB, C] VMEM scratch; on the last HW step finishes the pooling and runs
    linear -> BN(eval) -> LeakyReLU(0.1) -> classifier on the MXU.
    """
    hw_step = pl.program_id(1)

    @pl.when(hw_step == 0)
    def _init():
        max_sc[...] = jnp.full_like(max_sc, -jnp.inf)
        sum_sc[...] = jnp.zeros_like(sum_sc)

    xb = x_ref[...]                                       # [TB, C, THW], input dtype
    # Running max in the input dtype (exact in bf16); only the reduced [TB, C]
    # partial is cast to f32.
    tile_max = jnp.max(xb, axis=-1)
    max_sc[...] = jnp.maximum(max_sc[...], tile_max.astype(jnp.float32))
    # Running sum with f32 accumulation; the cast fuses into the per-vreg lane
    # reduction, so no full-tile f32 copy is materialized.
    sum_sc[...] = sum_sc[...] + jnp.sum(xb.astype(jnp.float32), axis=-1)

    @pl.when(hw_step == pl.num_programs(1) - 1)
    def _finalize():
        # pooled = global max-pool + global avg-pool (divide by the true HW).
        pooled = max_sc[...] + sum_sc[...] * (1.0 / hw_total)            # [TB, C] f32

        # f = linear(pooled): bf16 operands into the MXU, f32 accumulation.
        f = jnp.dot(pooled.astype(jnp.bfloat16), w1t_ref[...],
                    preferred_element_type=jnp.float32) + b1_ref[...]    # [TB, hidden]

        # BatchNorm1d (eval, pre-folded) -> LeakyReLU(0.1) (matches
        # nn.LeakyReLU(0.1) in the module) -> Dropout (eval: identity).
        h = f * scale_ref[...] + shift_ref[...]
        h = jnp.where(h >= 0.0, h, 0.1 * h)

        logits = jnp.dot(h.astype(jnp.bfloat16), w2t_ref[...],
                         preferred_element_type=jnp.float32) + b2_ref[...]

        f_ref[...] = f
        logits_ref[...] = logits


def _vmem_capacity_bytes():
    """Per-core VMEM capacity; conservative 64 MiB (v7x) if the query fails."""
    try:
        info = pltpu.get_tpu_info()
        cap = getattr(info, "vmem_capacity_bytes", None)
        if cap:
            return int(cap)
    except Exception:
        pass
    return 64 * 1024 * 1024


def _choose_tiles(B, C, HW, hidden, nclass_pad, x_itemsize, vmem_limit,
                  max_tile_hw=None):
    """VMEM-budgeted (generation-aware) tile sizes.

    Layout constraints: the outputs' second-to-last dim forces tile_b to be a
    multiple of 8 or the full batch; the x block's last dim forces tile_hw to
    be a multiple of 128 or the full HW.
    """
    # Bytes that do not scale with the x block: double-buffered bf16 weights
    # plus a margin for bias rows, output blocks, accumulators and padding.
    weight_bytes = 2 * 2 * (C * hidden + hidden * nclass_pad)
    misc_bytes = 4 * 1024 * 1024
    x_budget = max(vmem_limit - weight_bytes - misc_bytes, vmem_limit // 4)

    # tile_b: largest multiple-of-8 divisor of B such that
    #   (a) >= 2 batch tiles remain when B allows it (v7x: the "parallel" batch
    #       axis then shards across the two TensorCores), and
    #   (b) a ~512-lane HW tile still fits the double-buffered x budget.
    target_hw = HW if HW % 128 != 0 else min(512, HW)
    cap = x_budget // max(2 * C * target_hw * x_itemsize, 1)
    cap = int(min(cap, 64))
    if B >= 16 and B % 8 == 0:
        cap = min(cap, B // 2)
    tile_b = B
    if B % 8 == 0 and cap >= 8:
        for cand in range(cap - cap % 8, 7, -8):
            if B % cand == 0:
                tile_b = cand
                break

    # tile_hw: largest multiple of 128 dividing HW whose double-buffered block
    # fits the budget (full HW if HW is not 128-aligned).
    if HW % 128 == 0 and HW > 128:
        max_hw = max(x_budget // (2 * tile_b * C * x_itemsize), 128)
        if max_tile_hw is not None:
            max_hw = min(max_hw, max(int(max_tile_hw), 128))
        cand = min((max_hw // 128) * 128, HW)
        tile_hw = 128
        while cand >= 128:
            if HW % cand == 0:
                tile_hw = cand
                break
            cand -= 128
    else:
        tile_hw = HW
    return int(tile_b), int(tile_hw)


def deepten_net_forward(x_nchw, params, *, max_tile_hw=None):
    """Net.forward (post-backbone, non-CIFAR branch), eval-mode semantics.

    x_nchw: backbone feature map [B, C, H, W] (bf16 recommended: halves the
    streamed HBM bytes; the dtype is consumed as-is with no extra HBM pass).
    Returns (logits [B, nclass], f [B, hidden], classifier_weight [nclass, hidden]).
    """
    B, C, H, W = x_nchw.shape
    HW = H * W

    # [B, C, H, W] -> [B, C, HW] is a free reshape (no HBM transpose pass):
    # inside the kernel C sits on sublanes and HW on lanes.
    x = x_nchw.reshape(B, C, HW)

    w1, b1 = params["linear_w"], params["linear_b"]        # [hidden, C], [1, hidden]
    gamma, beta = params["bn_gamma"], params["bn_beta"]    # [1, hidden]
    rmean, rvar = params["bn_mean"], params["bn_var"]      # [1, hidden]
    w2, b2 = params["cls_w"], params["cls_b"]              # [nclass, hidden], [1, nclass]

    hidden = w1.shape[0]
    nclass = w2.shape[0]
    nclass_pad = pl.cdiv(nclass, 128) * 128                # lane-dense logits store

    # Pre-transposed (and zero-padded) bf16 weights: MXU reads stored layout.
    w1t = jnp.transpose(w1).astype(jnp.bfloat16)                              # [C, hidden]
    w2t = jnp.zeros((hidden, nclass_pad), jnp.bfloat16)
    w2t = w2t.at[:, :nclass].set(jnp.transpose(w2).astype(jnp.bfloat16))      # [hidden, ncp]
    b2p = jnp.zeros((1, nclass_pad), jnp.float32).at[:, :nclass].set(
        b2.astype(jnp.float32))

    # Fold eval-mode BatchNorm1d into a single scale/shift pair (f32).
    scale = (gamma * jax.lax.rsqrt(rvar + 1e-5)).astype(jnp.float32)
    shift = (beta - rmean * scale).astype(jnp.float32)
    b1f = b1.astype(jnp.float32)

    # Generation-aware VMEM budget (128 MiB on v5e/v6e, 64 MiB on v7x).
    vmem_limit = max(int(_vmem_capacity_bytes() * 0.8), 32 * 1024 * 1024)
    x_itemsize = jnp.dtype(x.dtype).itemsize
    tile_b, tile_hw = _choose_tiles(B, C, HW, hidden, nclass_pad, x_itemsize,
                                    vmem_limit, max_tile_hw=max_tile_hw)
    grid = (B // tile_b, HW // tile_hw)        # reduction (HW) axis last

    kernel = functools.partial(deepten_head_kernel, hw_total=float(HW))

    logits_pad, f = pl.pallas_call(
        kernel,
        grid_spec=pltpu.PrefetchScalarGridSpec(
            num_scalar_prefetch=0,
            grid=grid,
            in_specs=[
                pl.BlockSpec((tile_b, C, tile_hw), lambda b, k: (b, 0, k)),   # x
                pl.BlockSpec((C, hidden), lambda b, k: (0, 0)),               # w1^T
                pl.BlockSpec((1, hidden), lambda b, k: (0, 0)),               # linear bias
                pl.BlockSpec((1, hidden), lambda b, k: (0, 0)),               # BN scale
                pl.BlockSpec((1, hidden), lambda b, k: (0, 0)),               # BN shift
                pl.BlockSpec((hidden, nclass_pad), lambda b, k: (0, 0)),      # w2^T (padded)
                pl.BlockSpec((1, nclass_pad), lambda b, k: (0, 0)),           # cls bias (padded)
            ],
            out_specs=(
                pl.BlockSpec((tile_b, nclass_pad), lambda b, k: (b, 0)),      # logits
                pl.BlockSpec((tile_b, hidden), lambda b, k: (b, 0)),          # f
            ),
            scratch_shapes=[
                pltpu.VMEM((tile_b, C), jnp.float32),   # running max
                pltpu.VMEM((tile_b, C), jnp.float32),   # running sum
            ],
        ),
        out_shape=(
            jax.ShapeDtypeStruct((B, nclass_pad), jnp.float32),
            jax.ShapeDtypeStruct((B, hidden), jnp.float32),
        ),
        compiler_params=pltpu.CompilerParams(
            dimension_semantics=("parallel", "arbitrary"),
            vmem_limit_bytes=int(vmem_limit),
        ),
    )(x, w1t, b1f, scale, shift, w2t, b2p)

    logits = logits_pad[:, :nclass]
    # Net.forward returns (x, f, self.classifier.weight)
    return logits, f, w2


def init_params(key, feat_num, hidden, nclass):
    k1, k2, k3 = jax.random.split(key, 3)
    # self.linear: default PyTorch init (deterministic stand-in: scaled normal)
    linear_w = (jax.random.normal(k1, (hidden, feat_num), jnp.float32)
                / jnp.sqrt(jnp.float32(feat_num)))
    linear_b = jnp.zeros((1, hidden), jnp.float32)
    # head BatchNorm1d with weights_init_kaiming: weight ~ N(1.0, 0.02), bias = 0
    bn_gamma = (1.0 + 0.02 * jax.random.normal(k2, (hidden,), jnp.float32)).reshape(1, hidden)
    bn_beta = jnp.zeros((1, hidden), jnp.float32)
    bn_mean = jnp.zeros((1, hidden), jnp.float32)   # running_mean
    bn_var = jnp.ones((1, hidden), jnp.float32)     # running_var
    # classifier with weights_init_classifier: weight ~ N(0, 0.001), bias = 0
    cls_w = 0.001 * jax.random.normal(k3, (nclass, hidden), jnp.float32)
    cls_b = jnp.zeros((1, nclass), jnp.float32)
    return dict(linear_w=linear_w, linear_b=linear_b,
                bn_gamma=bn_gamma, bn_beta=bn_beta,
                bn_mean=bn_mean, bn_var=bn_var,
                cls_w=cls_w, cls_b=cls_b)


if __name__ == "__main__":
    key = jax.random.PRNGKey(0)
    kx, kp = jax.random.split(key)

    # Small synthetic shapes: backbone output feature map [B, feat_num, h, w],
    # handed to the head in bf16 (half the HBM bytes of the streamed input).
    B, feat_num, h, w = 2, 32, 16, 16
    hidden, nclass = 32, 10

    x = jax.random.normal(kx, (B, feat_num, h, w), jnp.float32).astype(jnp.bfloat16)
    params = init_params(kp, feat_num, hidden, nclass)

    # max_tile_hw=128 so the demo exercises the multi-step HW reduction path.
    logits, f, cls_w = deepten_net_forward(x, params, max_tile_hw=128)
    jax.block_until_ready((logits, f, cls_w))

    # Pure-JAX reference mirroring the kernel dataflow (bf16 feature map and
    # MXU operands, f32 accumulation and f32 elementwise math).
    xf = x.astype(jnp.float32).reshape(B, feat_num, -1)            # [B, C, HW]
    pooled = jnp.max(xf, axis=-1) + jnp.sum(xf, axis=-1) * (1.0 / (h * w))
    w1t_bf = params["linear_w"].T.astype(jnp.bfloat16)
    f_ref = jnp.dot(pooled.astype(jnp.bfloat16), w1t_bf,
                    preferred_element_type=jnp.float32) + params["linear_b"]
    bn_scale = params["bn_gamma"] * jax.lax.rsqrt(params["bn_var"] + 1e-5)
    bn_shift = params["bn_beta"] - params["bn_mean"] * bn_scale
    h_act = f_ref * bn_scale + bn_shift
    h_act = jnp.where(h_act >= 0.0, h_act, 0.1 * h_act)
    w2t_bf = params["cls_w"].T.astype(jnp.bfloat16)
    logits_ref = jnp.dot(h_act.astype(jnp.bfloat16), w2t_bf,
                         preferred_element_type=jnp.float32) + params["cls_b"]

    assert jnp.allclose(f, f_ref, atol=2e-2, rtol=2e-2), "feature mismatch"
    assert jnp.allclose(logits, logits_ref, atol=2e-3, rtol=2e-2), "logits mismatch"
    assert cls_w.shape == (nclass, hidden)

    print("KERNEL_OK")
</pallas_src>

<mosaic_0001>
module attributes {stable_mosaic.version = 11 : i64} {
  func.func @deepten_head_kernel(%arg0: i32, %arg1: i32, %arg2: memref<2x32x128xbf16, #tpu.memory_space<vmem>>, %arg3: memref<32x32xbf16, #tpu.memory_space<vmem>>, %arg4: memref<1x32xf32, #tpu.memory_space<vmem>>, %arg5: memref<1x32xf32, #tpu.memory_space<vmem>>, %arg6: memref<1x32xf32, #tpu.memory_space<vmem>>, %arg7: memref<32x128xbf16, #tpu.memory_space<vmem>>, %arg8: memref<1x128xf32, #tpu.memory_space<vmem>>, %arg9: memref<2x128xf32, #tpu.memory_space<vmem>>, %arg10: memref<2x32xf32, #tpu.memory_space<vmem>>, %arg11: memref<2x32xf32, #tpu.memory_space<vmem>>, %arg12: memref<2x32xf32, #tpu.memory_space<vmem>>) attributes {dimension_semantics = [#tpu.dimension_semantics<parallel>, #tpu.dimension_semantics<arbitrary>], iteration_bounds = array<i64: 1, 2>, scalar_prefetch = 0 : i64, scratch_operands = 2 : i64, tpu.core_type = #tpu.core_type<tc>, window_params = [{transform_indices = @transform_0, window_bounds = array<i64: 2, 32, 128>}, {pipeline_mode = #tpu.pipeline_mode<synchronous>, transform_indices = @transform_1, window_bounds = array<i64: 32, 32>}, {pipeline_mode = #tpu.pipeline_mode<synchronous>, transform_indices = @transform_2, window_bounds = array<i64: 1, 32>}, {pipeline_mode = #tpu.pipeline_mode<synchronous>, transform_indices = @transform_3, window_bounds = array<i64: 1, 32>}, {pipeline_mode = #tpu.pipeline_mode<synchronous>, transform_indices = @transform_4, window_bounds = array<i64: 1, 32>}, {pipeline_mode = #tpu.pipeline_mode<synchronous>, transform_indices = @transform_5, window_bounds = array<i64: 32, 128>}, {pipeline_mode = #tpu.pipeline_mode<synchronous>, transform_indices = @transform_6, window_bounds = array<i64: 1, 128>}, {transform_indices = @transform_7, window_bounds = array<i64: 2, 128>}, {transform_indices = @transform_8, window_bounds = array<i64: 2, 32>}]} {
    %c0_i32 = arith.constant 0 : i32
    %0 = arith.cmpi eq, %arg1, %c0_i32 : i32
    %1 = arith.extui %0 : i1 to i32
    %c0_i32_0 = arith.constant 0 : i32
    %2 = arith.cmpi ne, %1, %c0_i32_0 : i32
    scf.if %2 {
      %cst_13 = arith.constant 0xFF800000 : f32
      %17 = vector.broadcast %cst_13 : f32 to vector<2x32xf32>
      %c0_14 = arith.constant 0 : index
      %c0_15 = arith.constant 0 : index
      %18 = vector.load %arg11[%c0_14, %c0_15] : memref<2x32xf32, #tpu.memory_space<vmem>>, vector<2x32xf32>
      tpu.vector_store %arg11[%c0_14, %c0_15], %17 {strides = array<i32>} : memref<2x32xf32, #tpu.memory_space<vmem>>, vector<2x32xf32>,
      %cst_16 = arith.constant 0.000000e+00 : f32
      %19 = vector.broadcast %cst_16 : f32 to vector<2x32xf32>
      %c0_17 = arith.constant 0 : index
      %c0_18 = arith.constant 0 : index
      %20 = vector.load %arg12[%c0_17, %c0_18] : memref<2x32xf32, #tpu.memory_space<vmem>>, vector<2x32xf32>
      tpu.vector_store %arg12[%c0_17, %c0_18], %19 {strides = array<i32>} : memref<2x32xf32, #tpu.memory_space<vmem>>, vector<2x32xf32>,
    } else {
    }
    %c0 = arith.constant 0 : index
    %c0_1 = arith.constant 0 : index
    %c0_2 = arith.constant 0 : index
    %3 = vector.load %arg2[%c0, %c0_1, %c0_2] : memref<2x32x128xbf16, #tpu.memory_space<vmem>>, vector<2x32x128xbf16>
    %cst = arith.constant dense<0xFF80> : vector<2x32xbf16>
    %4 = vector.multi_reduction <maximumf>, %3, %cst [2] : vector<2x32x128xbf16> to vector<2x32xbf16>
    %c0_3 = arith.constant 0 : index
    %c0_4 = arith.constant 0 : index
    %5 = vector.load %arg11[%c0_3, %c0_4] : memref<2x32xf32, #tpu.memory_space<vmem>>, vector<2x32xf32>
    %6 = arith.extf %4 : vector<2x32xbf16> to vector<2x32xf32>
    %7 = arith.maximumf %5, %6 : vector<2x32xf32>
    %c0_5 = arith.constant 0 : index
    %c0_6 = arith.constant 0 : index
    %8 = vector.load %arg11[%c0_5, %c0_6] : memref<2x32xf32, #tpu.memory_space<vmem>>, vector<2x32xf32>
    tpu.vector_store %arg11[%c0_5, %c0_6], %7 {strides = array<i32>} : memref<2x32xf32, #tpu.memory_space<vmem>>, vector<2x32xf32>,
    %c0_7 = arith.constant 0 : index
    %c0_8 = arith.constant 0 : index
    %9 = vector.load %arg12[%c0_7, %c0_8] : memref<2x32xf32, #tpu.memory_space<vmem>>, vector<2x32xf32>
    %10 = arith.extf %3 : vector<2x32x128xbf16> to vector<2x32x128xf32>
    %cst_9 = arith.constant dense<0.000000e+00> : vector<2x32xf32>
    %11 = vector.multi_reduction <add>, %10, %cst_9 [2] : vector<2x32x128xf32> to vector<2x32xf32>
    %12 = arith.addf %9, %11 : vector<2x32xf32>
    %c0_10 = arith.constant 0 : index
    %c0_11 = arith.constant 0 : index
    %13 = vector.load %arg12[%c0_10, %c0_11] : memref<2x32xf32, #tpu.memory_space<vmem>>, vector<2x32xf32>
    tpu.vector_store %arg12[%c0_10, %c0_11], %12 {strides = array<i32>} : memref<2x32xf32, #tpu.memory_space<vmem>>, vector<2x32xf32>,
    %c1_i32 = arith.constant 1 : i32
    %14 = arith.cmpi eq, %arg1, %c1_i32 : i32
    %15 = arith.extui %14 : i1 to i32
    %c0_i32_12 = arith.constant 0 : i32
    %16 = arith.cmpi ne, %15, %c0_i32_12 : i32
    scf.if %16 {
      %c0_13 = arith.constant 0 : index
      %c0_14 = arith.constant 0 : index
      %17 = vector.load %arg11[%c0_13, %c0_14] : memref<2x32xf32, #tpu.memory_space<vmem>>, vector<2x32xf32>
      %c0_15 = arith.constant 0 : index
      %c0_16 = arith.constant 0 : index
      %18 = vector.load %arg12[%c0_15, %c0_16] : memref<2x32xf32, #tpu.memory_space<vmem>>, vector<2x32xf32>
      %cst_17 = arith.constant 3.906250e-03 : f32
      %19 = vector.broadcast %cst_17 : f32 to vector<2x32xf32>
      %20 = arith.mulf %18, %19 : vector<2x32xf32>
      %21 = arith.addf %17, %20 : vector<2x32xf32>
      %22 = arith.truncf %21 : vector<2x32xf32> to vector<2x32xbf16>
      %c0_18 = arith.constant 0 : index
      %c0_19 = arith.constant 0 : index
      %23 = vector.load %arg3[%c0_18, %c0_19] : memref<32x32xbf16, #tpu.memory_space<vmem>>, vector<32x32xbf16>
      %cst_20 = arith.constant dense<0.000000e+00> : vector<2x32xf32>
      %24 = tpu.matmul %22, %23, %cst_20 {dimension_numbers = #tpu.dot_dimension_numbers<[1], [0], [0], [1], [0, 0, 1, 1], [], []>} : vector<2x32xbf16>, vector<32x32xbf16>, vector<2x32xf32> -> vector<2x32xf32>
      %c0_21 = arith.constant 0 : index
      %c0_22 = arith.constant 0 : index
      %25 = vector.load %arg4[%c0_21, %c0_22] : memref<1x32xf32, #tpu.memory_space<vmem>>, vector<1x32xf32>
      %26 = vector.broadcast %25 : vector<1x32xf32> to vector<2x32xf32>
      %27 = arith.addf %24, %26 : vector<2x32xf32>
      %c0_23 = arith.constant 0 : index
      %c0_24 = arith.constant 0 : index
      %28 = vector.load %arg5[%c0_23, %c0_24] : memref<1x32xf32, #tpu.memory_space<vmem>>, vector<1x32xf32>
      %29 = vector.broadcast %28 : vector<1x32xf32> to vector<2x32xf32>
      %30 = arith.mulf %27, %29 : vector<2x32xf32>
      %c0_25 = arith.constant 0 : index
      %c0_26 = arith.constant 0 : index
      %31 = vector.load %arg6[%c0_25, %c0_26] : memref<1x32xf32, #tpu.memory_space<vmem>>, vector<1x32xf32>
      %32 = vector.broadcast %31 : vector<1x32xf32> to vector<2x32xf32>
      %33 = arith.addf %30, %32 : vector<2x32xf32>
      %cst_27 = arith.constant 0.000000e+00 : f32
      %34 = vector.broadcast %cst_27 : f32 to vector<2x32xf32>
      %35 = arith.cmpf oge, %33, %34 : vector<2x32xf32>
      %cst_28 = arith.constant 1.000000e-01 : f32
      %36 = vector.broadcast %cst_28 : f32 to vector<2x32xf32>
      %37 = arith.mulf %36, %33 : vector<2x32xf32>
      %38 = arith.select %35, %33, %37 : vector<2x32xi1>, vector<2x32xf32>
      %39 = arith.truncf %38 : vector<2x32xf32> to vector<2x32xbf16>
      %c0_29 = arith.constant 0 : index
      %c0_30 = arith.constant 0 : index
      %40 = vector.load %arg7[%c0_29, %c0_30] : memref<32x128xbf16, #tpu.memory_space<vmem>>, vector<32x128xbf16>
      %cst_31 = arith.constant dense<0.000000e+00> : vector<2x128xf32>
      %41 = tpu.matmul %39, %40, %cst_31 {dimension_numbers = #tpu.dot_dimension_numbers<[1], [0], [0], [1], [0, 0, 1, 1], [], []>} : vector<2x32xbf16>, vector<32x128xbf16>, vector<2x128xf32> -> vector<2x128xf32>
      %c0_32 = arith.constant 0 : index
      %c0_33 = arith.constant 0 : index
      %42 = vector.load %arg8[%c0_32, %c0_33] : memref<1x128xf32, #tpu.memory_space<vmem>>, vector<1x128xf32>
      %43 = vector.broadcast %42 : vector<1x128xf32> to vector<2x128xf32>
      %44 = arith.addf %41, %43 : vector<2x128xf32>
      %c0_34 = arith.constant 0 : index
      %c0_35 = arith.constant 0 : index
      %45 = vector.load %arg10[%c0_34, %c0_35] : memref<2x32xf32, #tpu.memory_space<vmem>>, vector<2x32xf32>
      tpu.vector_store %arg10[%c0_34, %c0_35], %27 {strides = array<i32>} : memref<2x32xf32, #tpu.memory_space<vmem>>, vector<2x32xf32>,
      %c0_36 = arith.constant 0 : index
      %c0_37 = arith.constant 0 : index
      %46 = vector.load %arg9[%c0_36, %c0_37] : memref<2x128xf32, #tpu.memory_space<vmem>>, vector<2x128xf32>
      tpu.vector_store %arg9[%c0_36, %c0_37], %44 {strides = array<i32>} : memref<2x128xf32, #tpu.memory_space<vmem>>, vector<2x128xf32>,
    } else {
    }
    return
  }
  func.func @transform_0(%arg0: i32, %arg1: i32) -> (i32, i32, i32) {
    %c0_i32 = arith.constant 0 : i32
    %c0_i32_0 = arith.constant 0 : i32
    return %arg0, %c0_i32, %arg1 : i32, i32, i32
  }
  func.func @transform_1(%arg0: i32, %arg1: i32) -> (i32, i32) {
    %c0_i32 = arith.constant 0 : i32
    %c0_i32_0 = arith.constant 0 : i32
    %c0_i32_1 = arith.constant 0 : i32
    return %c0_i32, %c0_i32_0 : i32, i32
  }
  func.func @transform_2(%arg0: i32, %arg1: i32) -> (i32, i32) {
    %c0_i32 = arith.constant 0 : i32
    %c0_i32_0 = arith.constant 0 : i32
    %c0_i32_1 = arith.constant 0 : i32
    return %c0_i32, %c0_i32_0 : i32, i32
  }
  func.func @transform_3(%arg0: i32, %arg1: i32) -> (i32, i32) {
    %c0_i32 = arith.constant 0 : i32
    %c0_i32_0 = arith.constant 0 : i32
    %c0_i32_1 = arith.constant 0 : i32
    return %c0_i32, %c0_i32_0 : i32, i32
  }
  func.func @transform_4(%arg0: i32, %arg1: i32) -> (i32, i32) {
    %c0_i32 = arith.constant 0 : i32
    %c0_i32_0 = arith.constant 0 : i32
    %c0_i32_1 = arith.constant 0 : i32
    return %c0_i32, %c0_i32_0 : i32, i32
  }
  func.func @transform_5(%arg0: i32, %arg1: i32) -> (i32, i32) {
    %c0_i32 = arith.constant 0 : i32
    %c0_i32_0 = arith.constant 0 : i32
    %c0_i32_1 = arith.constant 0 : i32
    return %c0_i32, %c0_i32_0 : i32, i32
  }
  func.func @transform_6(%arg0: i32, %arg1: i32) -> (i32, i32) {
    %c0_i32 = arith.constant 0 : i32
    %c0_i32_0 = arith.constant 0 : i32
    %c0_i32_1 = arith.constant 0 : i32
    return %c0_i32, %c0_i32_0 : i32, i32
  }
  func.func @transform_7(%arg0: i32, %arg1: i32) -> (i32, i32) {
    %c0_i32 = arith.constant 0 : i32
    %c0_i32_0 = arith.constant 0 : i32
    return %arg0, %c0_i32 : i32, i32
  }
  func.func @transform_8(%arg0: i32, %arg1: i32) -> (i32, i32) {
    %c0_i32 = arith.constant 0 : i32
    %c0_i32_0 = arith.constant 0 : i32
    return %arg0, %c0_i32 : i32, i32
  }
}

</mosaic_0001>

<bundles_post_ra>
// kernel: tpu_custom_call.1
= control target key start
LH: loop header
LB: loop body
LE: loop exit
PB: predicated region body
PF: predicated region fallthrough
CT: control target
= control target key end

     0   :  { %s1540_s0 = inlined_call_operand.hbm [shape: bf16[2,32,256], index: 0, kind: input, shape index: {}]   ;;  %s1541_s1 = inlined_call_operand.hbm [shape: bf16[32,32], index: 1, kind: input, shape index: {}]   ;;  %s1542_s2 = inlined_call_operand.vmem [shape: f32[1,32], index: 2, kind: input, shape index: {}]   ;;  %s1543_s3 = inlined_call_operand.vmem [shape: f32[1,32], index: 3, kind: input, shape index: {}]   ;;  %s1544_s4 = inlined_call_operand.hbm [shape: f32[1,32], index: 4, kind: input, shape index: {}]   ;;  %s1545_s5 = inlined_call_operand.vmem [shape: bf16[32,128], index: 5, kind: input, shape index: {}]   ;;  %s1546_s6 = inlined_call_operand.vmem [shape: f32[1,128], index: 6, kind: input, shape index: {}]   ;;  %s1547_s7 = inlined_call_operand.hbm [shape: f32[2,128], index: 7, kind: output, shape index: {0}]   ;;  %s1548_s8 = inlined_call_operand.hbm [shape: f32[2,32], index: 8, kind: output, shape index: {1}]  }
   0x1   :  { %1558 = sst [smem:[#allocation17_spill]] %s1547_s7 }
   0x2   :  { %1559 = sst [smem:[#allocation18_spill]] %s1548_s8 }
   0x3   :  { %14 = vsyncpa [#allocation5], 0 }
   0x4   :  { %16 = vsyncpa [#allocation5 + $0x1], 0 }
   0x5   :  { %17 = vsyncpa [#allocation8], 0 }
   0x6   :  { %18 = vsyncpa [#allocation6], 0 }
   0x7   :  { %19 = vsyncpa [#allocation12], 0  ;;  %s1261_s27 = smov 0   ;;  %s1263_s28 = smov 0  }
   0x8   :  { %s1265_s29 = smov 0   ;;  %s1267_s30 = smov 0  }
   0x9   :  { %s1269_s9 = smov 0   ;;  %s1271_s10 = smov 0  }
   0xa LB: > { %s1554_s11 = sadd.s32 4294967295, %s1202_s10   ;;  %p53_p0 = scmp.ne.s32.totalorder %s1190_s29, %s1186_s28  ;;  %s1202_s10 = sphi %s1271_s10, %s25_s10   ;;  %s1198_s9 = sphi %s1269_s9, %s1578_s9   ;;  %s1194_s30 = sphi %s1267_s30, %s1577_s30   ;;  %s1190_s29 = sphi %s1265_s29, %s1576_s29   ;;  %s1186_s28 = sphi %s1263_s28, %s1575_s28   ;;  %s1182_s27 = sphi %s1261_s27, %s1574_s27  }
   0xb   : > { %p54_p1 = scmp.eq.s32.totalorder %s1202_s10, 0  ;;  %p59_p2 = scmp.ne.s32.totalorder %s1186_s28, %s1182_s27 }
   0xc   : > { %p1296_p3 = scmp.eq.s32.totalorder %s1554_s11, 0  ;;  %p839_p4 = scmp.ge.s32.totalorder %s1202_s10, 1 }
   0xd   : > { %p55_p5 = por %p54_p1, %p53_p0  ;;  %p248_p6 = scmp.lt.s32.totalorder %s1202_s10, 3 }
   0xe   : > { %s1560_s12 = scalar_select %p1296_p3, 1, 0 }
   0xf   : > { %p1304_p7 = por %p1296_p3, %p59_p2  ;;  %p1308_p8 = pnand %p839_p4, %p248_p6 }
  0x10   : > { %s1204_s15 = smov [#allocation7]   ;;  %p924_p11 = scmp.lt.s32.totalorder %s1202_s10, 2 }
  0x11   : > { %s1561_s13 = scalar_select %p1304_p7, 1, 0 }
  0x12   : > { %s1562_s14 = scalar_select %p1308_p8, 1, 0 }
  0x13   : > { %s260_s16 = sshll.u32 %s1204_s15, 4  ;;  %p911_p9 = pneg %p1308_p8  ;;  %s261_s16 = int_to_ptr.vmem [resolvable:$true] %s260_s16 }
  0x14   : > { %p1321_p12 = pnand %p924_p11, %p55_p5  ;;  %s1002_s21 = scalar_lea.hbm %s1541_s1, 256 }
  0x15   : > { %p1316_p10 = pnand %p911_p9, %p1296_p3  ;;  %p1003_p13 = scmp.ne.s32.totalorder %s1541_s1, %s1002_s21 }
  0x16   : > { %s1564_s18 = scalar_select %p1321_p12, 1, 0 }
  0x17   : > { %p1004_p0 = pneg %p1316_p10  ;;  %p1009_p4 = scmp.lt.u32.totalorder %s1002_s21, %s1541_s1 }
  0x19   : > { %p1005_p1 = pnand %p1004_p0, %p1003_p13 }
  0x1b   : > { %p1006_p2 = pneg %p1005_p1 }
  0x1d   : > { %p1011_p5 = pnand %p1009_p4, %p1006_p2 }
  0x1f   : > { %1014 = shalt.err (!%p1011_p5)
}
  0x20   : > { %s1015_s26 = scalar_lea.vmem %s261_s16, 256  ;;  %p1023_p3 = scmp.lt.s32.totalorder %s261_s16, %s261_s16 }
  0x21   : > { %p1016_p6 = scmp.ne.s32.totalorder %s261_s16, %s1015_s26  ;;  %p1024_p7 = scmp.lt.s32.totalorder %s1015_s26, %s1015_s26 }
  0x23   : > { %p1018_p9 = pnand %p1016_p6, %p1004_p0  ;;  %p1025_p8 = por %p1024_p7, %p1023_p3 }
  0x25   : > { %p1019_p11 = pneg %p1018_p9 }
  0x27   : > { %p1026_p12 = pnand %p1025_p8, %p1019_p11 }
  0x29   : > { %1029 = shalt.err (!%p1026_p12)
}
  0x2a   : > { %s1557_s27 = smov 64   ;;  %s1206_s15 = smov 4  }
  0x2b   : > { %914 = dma.hbm_to_vmem [thread:$0]  (!%p1316_p10), %s1541_s1, 256, %s261_s16, [#allocation8], %s1557_s27, %s1557_s27, %s1206_s15  }
  0x2c   : > { %s1207_s21 = smov [#allocation9]   ;;  %s1030_s25 = scalar_lea.hbm %s1544_s4, 16 }
  0x2d   : > { %s280_s22 = sshll.u32 %s1207_s21, 4  ;;  %p1031_p3 = scmp.ne.s32.totalorder %s1544_s4, %s1030_s25  ;;  %s281_s22 = int_to_ptr.vmem [resolvable:$true] %s280_s22 }
  0x2e   : > { %p1037_p12 = scmp.lt.u32.totalorder %s1030_s25, %s1544_s4 }
  0x2f   : > { %p1033_p7 = pnand %p1031_p3, %p1004_p0 }
  0x31   : > { %p1034_p8 = pneg %p1033_p7 }
  0x33   : > { %p1039_p13 = pnand %p1037_p12, %p1034_p8 }
  0x35   : > { %1042 = shalt.err (!%p1039_p13)
}
  0x36   : > { %s1043_s16 = scalar_lea.vmem %s281_s22, 16  ;;  %s1050_s19 = scalar_lea.vmem %s281_s22, 32 }
  0x37   : > { %p1044_p1 = scmp.ne.s32.totalorder %s281_s22, %s1043_s16  ;;  %p1051_p5 = scmp.lt.s32.totalorder %s281_s22, %s281_s22 }
  0x38   : > { %p1052_p6 = scmp.lt.s32.totalorder %s1050_s19, %s1043_s16 }
  0x39   : > { %p1046_p2 = pnand %p1044_p1, %p1004_p0 }
  0x3a   : > { %p1053_p9 = por %p1052_p6, %p1051_p5 }
  0x3b   : > { %p1047_p4 = pneg %p1046_p2 }
  0x3d   : > { %p1054_p11 = pnand %p1053_p9, %p1047_p4 }
  0x3f   : > { %1057 = shalt.err (!%p1054_p11)
}
  0x40   : > { %917 = dma.hbm_to_vmem [thread:$0]  (!%p1316_p10), %s1544_s4, 16, %s281_s22, [#allocation8]  }
  0x41   : > { %s34_s8 = sadd.s32 1, %s1198_s9  ;;  %s46_s20 = sadd.s32 1, %s1190_s29 }
  0x42   : > { %p35_p0 = scmp.ge.s32.totalorder %s34_s8, 2  ;;  %s297_s21 = sand.u32 1, %s1190_s29  }
  0x43   : > { %s843_s23 = sshll.u32 %s297_s21, 5  ;;  %s844_s17 = sshll.u32 %s1198_s9, 6 }
  0x44   : > { %s1580_s8 = smov (%p35_p0, %s34_s8), 0  ;;  %s1381_s16 = scalar_lea.hbm %s1540_s0, %s844_s17 }
  0x45   : > { %s42_s24 = ssub.s32 %s1198_s9, %s1580_s8  ;;  %s301_s22 = scalar_lea.vmem [#allocation4], %s843_s23 }
  0x46   : > { %p44_p10 = scmp.eq.s32.totalorder %s42_s24, 0  ;;  %s310_s19 = sshll.u32 %s301_s22, 4  ;;  %s1383_s19 = int_to_ptr.vmem [resolvable:$true] %s310_s19 }
  0x47   : > { %s1388_s7 = scalar_lea.sflag [#allocation5], %s297_s21  ;;  %s1058_s27 = scalar_lea.hbm %s1381_s16, 512 }
  0x48   : > { %s1386_s11 = scalar_select %p44_p10, %s1190_s29, %s46_s20  }
  0x49   : > { %p1059_p3 = scmp.ne.s32.totalorder %s1381_s16, %s1058_s27  ;;  %p1565_p7 = scmp.ne.s32.totalorder %s1564_s18, 0 }
  0x4a   : > { %s1063_s24 = scalar_lea.hbm %s1540_s0, 1024  ;;  %p1064_p1 = scmp.lt.u32.totalorder %s1381_s16, %s1540_s0 }
  0x4b   : > { %p1060_p8 = pneg %p1565_p7  ;;  %p1065_p2 = scmp.lt.u32.totalorder %s1063_s24, %s1058_s27 }
  0x4c   : > { %p1067_p5 = scmp.lt.u32.totalorder %s1058_s27, %s1381_s16 }
  0x4d   : > { %p1061_p12 = pnand %p1060_p8, %p1059_p3  ;;  %p1066_p4 = por %p1065_p2, %p1064_p1 }
  0x4f   : > { %p1062_p13 = pneg %p1061_p12  ;;  %p1068_p6 = por %p1067_p5, %p1066_p4 }
  0x51   : > { %p1069_p9 = pnand %p1068_p6, %p1062_p13 }
  0x53   : > { %1072 = shalt.err (!%p1069_p9)
}
  0x54   : > { %s1073_s20 = scalar_lea.vmem %s1383_s19, 512  ;;  %s1208_s21 = smov [#allocation4]  }
  0x55   : > { %p1074_p11 = scmp.ne.s32.totalorder %s1383_s19, %s1073_s20  ;;  %s1078_s22 = sshll.u32 %s1208_s21, 4  ;;  %s1079_s22 = int_to_ptr.vmem [resolvable:$false] %s1078_s22 }
  0x56   : > { %s1080_s17 = scalar_lea.vmem %s1079_s22, 1024  ;;  %p1081_p3 = scmp.lt.s32.totalorder %s1383_s19, %s1079_s22 }
  0x57   : > { %p1076_p0 = pnand %p1074_p11, %p1060_p8  ;;  %p1082_p12 = scmp.lt.s32.totalorder %s1080_s17, %s1073_s20 }
  0x59   : > { %p1077_p10 = pneg %p1076_p0  ;;  %p1083_p1 = por %p1082_p12, %p1081_p3 }
  0x5b   : > { %p1084_p2 = pnand %p1083_p1, %p1077_p10 }
  0x5d   : > { %1087 = shalt.err (!%p1084_p2)
}
  0x5e   : > { %s1209_s27 = smov 128   ;;  %s1566_s25 = smov 64  }
  0x5f   : > { %921 = dma.hbm_to_vmem [thread:$0]  (!%p1565_p7), %s1381_s16, 512, %s1383_s19, %s1388_s7, %s1209_s27, %s1566_s25, %s1206_s15  }
  0x60   : > { %p1567_p8 = scmp.ne.s32.totalorder %s1562_s14, 0 }
  0x61   : > { %s324_s24 = sand.u32 (!%p1567_p8), 1, %s1186_s28   ;;  %p1568_p13 = scmp.ne.s32.totalorder (!%p1567_p8), %s1561_s13, 0 }
  0x62   : > { %322 = sbr.rel (%p1567_p8) target bundleno = 807 (0x327), region = 48  ;;  %s846_s23 = sshll.u32 (!%p1567_p8), %s324_s24, 5 }
  0x63   : > { %s325_s26 = scalar_lea.sflag (!%p1567_p8), [#allocation5], %s324_s24  ;;  %s328_s20 = scalar_lea.vmem (!%p1567_p8), [#allocation4], %s846_s23 }
  0x69   : > { %1165 = dma.done.wait (%p1568_p13), %s325_s26, 512  }
  0x6a   : > { %1167 = vsyncadd (%p1568_p13), %s325_s26, 4294966784  ;;  %p1569_p4 = scmp.ne.s32.totalorder %s1560_s12, 0 }
  0x6c   : > { %1169 = dma.done.wait (%p1569_p4), [#allocation8], 272  }
  0x6d   : > { %1171 = vsyncadd (%p1569_p4), [#allocation8], 4294967024  ;;  %p849_p7 = scmp.ne.s32.totalorder %s1194_s30, 0 }
  0x6e   : > { %vm370_vm0 = vcmask (!%p849_p7), 254976   ;;  %v1210_v0 = vmov (!%p849_p7), -inf   ;;  %v1211_v1 = vmov (!%p849_p7), 0.0  }
  0x6f   : > { %369 = sbr.rel (%p849_p7) target bundleno = 118 (0x76), region = 64  ;;  %371 = vst.msk [vmem:[#allocation2] sm:$0x3] (!%p849_p7), %vm370_vm0, %v1210_v0  ;;  %372 = vst.msk [vmem:[#allocation3] sm:$0x3] (!%p849_p7), %vm370_vm0, %v1211_v1 }
  0x76 PF: > { %v375_v2 = vld [vmem:[%s328_s20 + $0x8] sm:$0xff]   ;;  %v373_v3 = vld [vmem:[%s328_s20] sm:$0xff]   ;;  %v379_v4 = vld [vmem:[%s328_s20 + $0x18] sm:$0xff]   ;;  %v430_v14 = vlaneseq  ;;  %vm441_vm1 = vcmask 130112   ;;  %vm448_vm2 = vcmask 195712   ;;  %vm455_vm3 = vcmask 261312  }
  0x77   : > { %407 = vmax.xlane.bf16.xlu1 %v375_v2  ;;  %405 = vmax.xlane.bf16.xlu0 %v373_v3  ;;  %v377_v5 = vld [vmem:[%s328_s20 + $0x10] sm:$0xff]   ;;  %v484_v6 = vunpack.c.h.bf16 %v373_v3  ;;  %v483_v7 = vunpack.c.l.bf16 %v373_v3  ;;  %v489_v10 = vunpack.c.l.bf16 %v379_v4  ;;  %v485_v11 = vunpack.c.l.bf16 %v375_v2  ;;  %v413_v50 = vld [vmem:[#allocation2] sm:$0x3]  ;;  %p854_p5 = scmp.ne.s32.totalorder %s1194_s30, 1 }
  0x78   : > { %v488_v8 = vunpack.c.h.bf16 %v377_v5  ;;  %v487_v9 = vunpack.c.l.bf16 %v377_v5  ;;  %v490_v12 = vunpack.c.h.bf16 %v379_v4  ;;  %v486_v13 = vunpack.c.h.bf16 %v375_v2 }
  0x79   : > { %v431_v15 = vand.u32 127, %v430_v14  ;;  %v433_v16 = vshrl.u32 %v430_v14, 7  ;;  %vm476_vm4 = vcmask 1041409   ;;  %vm480_vm5 = vcmask 254976   ;;  %v998_v14 = vld [vmem:[#allocation7] sm:$0xff] (!%p854_p5)  }
  0x7a   : > { %vm1213_vm6 = vmmov (!%p854_p5), 0   ;;  %vm589_vm7 = vcmask (!%p854_p5), 261120  }
  0x7b   : > { %v436_v17 = vadd.s32 4294967288, %v431_v15  ;;  %v443_v18 = vadd.s32 4294967280, %v431_v15  ;;  %v434_v19 = vsub.s32 %v431_v15, %v433_v16  ;;  %v450_v25 = vadd.s32 4294967272, %v431_v15 }
  0x7c   : > { %v1212_v15 = vmov (!%p854_p5), 0.0  }
  0x7d   : > { %v439_v20 = vsub.s32 %v436_v17, %v433_v16  ;;  %v446_v26 = vsub.s32 %v443_v18, %v433_v16  ;;  %v453_v30 = vsub.s32 %v450_v25, %v433_v16  ;;  %877 = vmatprep.subr.bf16.mxu0 (!%p854_p5), %v1212_v15  ;;  %885 = vmatprep.subr.bf16.mxu1 (!%p854_p5), %v1212_v15  ;;  %v999_v16 = vld [vmem:[#allocation7 + $0x8] sm:$0xff] (!%p854_p5)  }
  0x7e   : > { %878 = vmatpush3.bf16.msra.mxu0 (!%p854_p5), %v998_v14  ;;  %881 = vmatprep.mubr.msk.bf16.mxu0 (!%p854_p5), %vm1213_vm6, %v1212_v15 }
  0x7f   : > { %411 = vmax.xlane.bf16.xlu1 %v379_v4  ;;  %409 = vmax.xlane.bf16.xlu0 %v377_v5 }
  0x80   : > { %879 = vmatprep.subr.bf16.mxu0 (!%p854_p5), %v1212_v15  ;;  %889 = vmatprep.mubr.msk.bf16.mxu1 (!%p854_p5), %vm1213_vm6, %v1212_v15 }
  0x82   : > { %880 = vmatpush3.bf16.msra.mxu0 (!%p854_p5), %v999_v16 }
  0x87   : > { %493 = vadd.xlane.f32.xlu1 %v484_v6  ;;  %491 = vadd.xlane.f32.xlu0 %v483_v7 }
  0x8b   : > { %501 = vadd.xlane.f32.xlu1 %v488_v8  ;;  %499 = vadd.xlane.f32.xlu0 %v487_v9  ;;  %v482_v9 = vld [vmem:[#allocation3] sm:$0x3] }
  0x8f   : > { %503 = vadd.xlane.f32.xlu1 %v489_v10  ;;  %495 = vadd.xlane.f32.xlu0 %v485_v11 }
  0x93   : > { %505 = vadd.xlane.f32.xlu1 %v490_v12  ;;  %497 = vadd.xlane.f32.xlu0 %v486_v13 }
 0x108   : > { %v406_v21 = vpop.xlane.xlu0 %405  ;;  %v408_v22 = vpop.xlane.xlu1 %407 }
 0x109   : > { %v414_v23 = vunpack.c.l.bf16 %v406_v21  ;;  %v415_v24 = vunpack.c.h.bf16 %v406_v21  ;;  %v416_v27 = vunpack.c.l.bf16 %v408_v22  ;;  %v417_v31 = vunpack.c.h.bf16 %v408_v22  ;;  %v1000_v22 = vld [vmem:[%s1545_s5] sm:$0xff] (!%p854_p5)  }
 0x10a   : > { %886 = vmatpush3.bf16.msra.mxu1 (!%p854_p5), %v1000_v22 }
 0x10b   : > { %v435_v28 = vrot.slane %v414_v23, %v434_v19  ;;  %v440_v29 = vrot.slane %v415_v24, %v439_v20  ;;  %v447_v32 = vrot.slane %v416_v27, %v446_v26  ;;  %v454_v46 = vrot.slane %v417_v31, %v453_v30  ;;  %887 = vmatprep.subr.bf16.mxu1 (!%p854_p5), %v1212_v15  ;;  %v1001_v23 = vld [vmem:[%s1545_s5 + $0x8] sm:$0xff] (!%p854_p5)   ;;  %v855_v24 = vld [vmem:[%s1542_s2] ss:$0 sm:$0xff] (!%p854_p5) }
 0x10d   : > { %v442_v33 = vsel %vm441_vm1, %v440_v29, %v435_v28  ;;  %v860_v29 = vld [vmem:[#allocation9] ss:$0 sm:$0xff] (!%p854_p5) }
 0x10e   : > { %v449_v45 = vsel %vm448_vm2, %v447_v32, %v442_v33  ;;  %888 = vmatpush3.bf16.msra.mxu1 (!%p854_p5), %v1001_v23 }
 0x10f   : > { %v456_v51 = vsel %vm455_vm3, %v454_v46, %v449_v45 }
 0x110   : > { %v412_v34 = vpop.xlane.xlu1 %411  ;;  %v410_v35 = vpop.xlane.xlu0 %409 }
 0x111   : > { %v420_v36 = vunpack.c.l.bf16 %v412_v34  ;;  %v421_v37 = vunpack.c.h.bf16 %v412_v34  ;;  %v418_v38 = vunpack.c.l.bf16 %v410_v35  ;;  %v419_v39 = vunpack.c.h.bf16 %v410_v35 }
 0x113   : > { %v469_v40 = vrot.slane %v420_v36, %v446_v26  ;;  %v460_v41 = vrot.slane %v418_v38, %v434_v19  ;;  %v464_v42 = vrot.slane %v419_v39, %v439_v20  ;;  %v474_v47 = vrot.slane %v421_v37, %v453_v30  ;;  %v861_v37 = vld [vmem:[%s1546_s6] ss:$0 sm:$0xff] (!%p854_p5) }
 0x114   : > { %v494_v43 = vpop.xlane.xlu1 %493  ;;  %v492_v44 = vpop.xlane.xlu0 %491 }
 0x115   : > { %v465_v48 = vsel %vm441_vm1, %v464_v42, %v460_v41  ;;  %v522_v59 = vrot.slane %v494_v43, %v439_v20  ;;  %v518_v60 = vrot.slane %v492_v44, %v434_v19 }
 0x116   : > { %v470_v49 = vsel %vm448_vm2, %v469_v40, %v465_v48 }
 0x117   : > { %v475_v52 = vsel %vm455_vm3, %v474_v47, %v470_v49  ;;  %v523_v3 = vsel %vm441_vm1, %v522_v59, %v518_v60 }
 0x118   : > { %v502_v53 = vpop.xlane.xlu1 %501  ;;  %v500_v54 = vpop.xlane.xlu0 %499  ;;  %v477_v55 = vsel %vm476_vm4, %v475_v52, %v456_v51 }
 0x119   : > { %v479_v56 = vmax.f32 %v413_v50, %v477_v55  ;;  %v541_v61 = vrot.slane %v502_v53, %v439_v20  ;;  %v537_v62 = vrot.slane %v500_v54, %v434_v19 }
 0x11b   : > { %481 = vst.msk [vmem:[#allocation2] sm:$0x3] %vm480_vm5, %v479_v56  ;;  %v542_v4 = vsel %vm441_vm1, %v541_v61, %v537_v62 }
 0x11c   : > { %v504_v57 = vpop.xlane.xlu1 %503  ;;  %v496_v58 = vpop.xlane.xlu0 %495 }
 0x11d   : > { %v546_v63 = vrot.slane %v504_v57, %v446_v26  ;;  %v527_v0 = vrot.slane %v496_v58, %v446_v26  ;;  %v859_v26 = vld [vmem:[%s1543_s3] ss:$0 sm:$0xff] (!%p854_p5) }
 0x11f   : > { %v547_v7 = vsel %vm448_vm2, %v546_v63, %v542_v4  ;;  %v528_v8 = vsel %vm448_vm2, %v527_v0, %v523_v3 }
 0x120   : > { %v506_v1 = vpop.xlane.xlu1 %505  ;;  %v498_v2 = vpop.xlane.xlu0 %497 }
 0x121   : > { %v551_v5 = vrot.slane %v506_v1, %v453_v30  ;;  %v532_v6 = vrot.slane %v498_v2, %v453_v30  ;;  %560 = sbr.rel (%p854_p5) target bundleno = 747 (0x2eb), region = 68 }
 0x122   : > { %v561_v17 = vld [vmem:[#allocation2] sm:$0x3] (!%p854_p5) }
 0x123   : > { %v552_v10 = vsel %vm455_vm3, %v551_v5, %v547_v7  ;;  %v533_v11 = vsel %vm455_vm3, %v532_v6, %v528_v8 }
 0x124   : > { %v553_v12 = vsel %vm476_vm4, %v552_v10, %v533_v11 }
 0x125   : > { %v555_v13 = vadd.f32 %v553_v12, %v482_v9 }
 0x127   : > { %556 = vst.msk [vmem:[#allocation3] sm:$0x3] %vm480_vm5, %v555_v13 }
 0x12e   : > { %v562_v18 = vld [vmem:[#allocation3] sm:$0x3] }
 0x12f   : > { %v563_v19 = vmul.f32 0.00390625, %v562_v18 }
 0x131   : > { %v564_v20 = vadd.f32 %v563_v19, %v561_v17 }
 0x133   : > { %v565_v21 = vpack.c.bf16 %v564_v20, %v564_v20 }
 0x135   : > { %882 = vmatmul.mubr.msk.bf16.vlgmr.msra.gmra.mrb[0].mxu0 %vm589_vm7, %v565_v21 }
 0x208   : > { %v627_v25 = vpop.f32.mrb[0].mxu0 }
 0x209   : > { %v628_v27 = vadd.f32 %v855_v24, %v627_v25  ;;  %v883_v28 = vpop.f32.mrb[1].mxu0 }
 0x20a   : > { %v630_v30 = vpop.f32.mrb[2].mxu0 }
 0x20b   : > { %v640_v31 = vmul.f32 %v859_v26, %v628_v27  ;;  %719 = vst.msk [vmem:[#allocation11] sm:$0x3] %vm480_vm5, %v628_v27  ;;  %v884_v32 = vpop.f32.mrb[3].mxu0 }
 0x20d   : > { %v648_v33 = vadd.f32 %v860_v29, %v640_v31 }
 0x20f   : > { %vm649_vm8 = vcmp.ge.f32.partialorder %v648_v33, 0.0  ;;  %v650_v34 = vmul.f32 0.1, %v648_v33 }
 0x211   : > { %v651_v35 = vsel %vm649_vm8, %v648_v33, %v650_v34 }
 0x212   : > { %v652_v36 = vpack.c.bf16 %v651_v35, %v651_v35 }
 0x214   : > { %890 = vmatmul.mubr.msk.bf16.vlgmr.msra.gmra.mrb[0].mxu1 %vm589_vm7, %v652_v36 }
 0x2e7   : > { %v713_v38 = vpop.f32.mrb[0].mxu1 }
 0x2e8   : > { %v714_v39 = vadd.f32 %v861_v37, %v713_v38  ;;  %v891_v40 = vpop.f32.mrb[1].mxu1 }
 0x2e9   : > { %v716_v41 = vpop.f32.mrb[2].mxu1 }
 0x2ea   : > { %720 = vst [vmem:[#allocation10] sm:$0x3] %v714_v39  ;;  %v892_v42 = vpop.f32.mrb[3].mxu1 }
 0x2eb PF: > { %s1570_s22 = sadd.s32 4294967295, %s1202_s10   ;;  %s1214_s27 = smov [#allocation10]  }
 0x2ec   : > { %p1467_p6 = scmp.eq.s32.totalorder %s1570_s22, 1  ;;  %s730_s25 = sshll.u32 %s1214_s27, 4  ;;  %s731_s25 = int_to_ptr.vmem [resolvable:$true] %s730_s25 }
 0x2ed   : > { %s1215_s24 = smov [#allocation11]   ;;  %s1088_s26 = scalar_lea.vmem %s731_s25, 32 }
 0x2ee   : > { %s743_s23 = sshll.u32 %s1215_s24, 4  ;;  %p1089_p9 = scmp.ne.s32.totalorder %s731_s25, %s1088_s26  ;;  %s1471_s23 = int_to_ptr.vmem [resolvable:$true] %s743_s23 }
 0x2ef   : > { %p1095_p10 = scmp.lt.s32.totalorder %s731_s25, %s731_s25  ;;  %p1096_p3 = scmp.lt.s32.totalorder %s1088_s26, %s1088_s26 }
 0x2f0   : > { %p1090_p11 = pnand %p1089_p9, %p1467_p6 }
 0x2f1   : > { %p1097_p12 = por %p1096_p3, %p1095_p10 }
 0x2f2   : > { %p1091_p0 = pneg %p1090_p11 }
 0x2f4   : > { %p1098_p1 = pnand %p1097_p12, %p1091_p0 }
 0x2f6   : > { %1101 = shalt.err (!%p1098_p1)
}
 0x2f7   : > { %s1572_s12 = sld [smem:[#allocation17_spill]] }
 0x2fd   : > { %s1102_s13 = scalar_lea.hbm %s1572_s12, 32 }
 0x2fe   : > { %p1103_p2 = scmp.ne.s32.totalorder %s1572_s12, %s1102_s13  ;;  %p1108_p4 = scmp.lt.u32.totalorder %s1102_s13, %s1572_s12 }
 0x300   : > { %p1104_p8 = pnand %p1103_p2, %p1467_p6 }
 0x302   : > { %p1105_p13 = pneg %p1104_p8 }
 0x304   : > { %p1110_p7 = pnand %p1108_p4, %p1105_p13 }
 0x306   : > { %1113 = shalt.err (!%p1110_p7)
}
 0x307   : > { %904 = dma.vmem_to_hbm [thread:$0]  (%p1467_p6), %s731_s25, 32, %s1572_s12, [#allocation6]  }
 0x308   : > { %s1114_s21 = scalar_lea.vmem %s1471_s23, 32  ;;  %p1121_p0 = scmp.lt.s32.totalorder %s1471_s23, %s1471_s23 }
 0x309   : > { %p1115_p5 = scmp.ne.s32.totalorder %s1471_s23, %s1114_s21  ;;  %p1122_p10 = scmp.lt.s32.totalorder %s1114_s21, %s1114_s21 }
 0x30b   : > { %p1116_p9 = pnand %p1115_p5, %p1467_p6  ;;  %p1123_p3 = por %p1122_p10, %p1121_p0 }
 0x30d   : > { %p1117_p11 = pneg %p1116_p9 }
 0x30f   : > { %p1124_p12 = pnand %p1123_p3, %p1117_p11 }
 0x311   : > { %1127 = shalt.err (!%p1124_p12)
}
 0x312   : > { %s1573_s24 = sld [smem:[#allocation18_spill]] }
 0x318   : > { %s1128_s26 = scalar_lea.hbm %s1573_s24, 32 }
 0x319   : > { %p1129_p1 = scmp.ne.s32.totalorder %s1573_s24, %s1128_s26  ;;  %p1134_p13 = scmp.lt.u32.totalorder %s1128_s26, %s1573_s24 }
 0x31b   : > { %p1130_p2 = pnand %p1129_p1, %p1467_p6 }
 0x31d   : > { %p1131_p8 = pneg %p1130_p2 }
 0x31f   : > { %p1136_p4 = pnand %p1134_p13, %p1131_p8 }
 0x321   : > { %1139 = shalt.err (!%p1136_p4)
}
 0x322   : > { %906 = dma.vmem_to_hbm [thread:$0]  (%p1467_p6), %s1471_s23, 32, %s1573_s24, [#allocation12]  }
 0x323   : > { %1173 = dma.done.wait (%p1467_p6), [#allocation6], 32  }
 0x324   : > { %1175 = vsyncadd (%p1467_p6), [#allocation6], 4294967264 }
 0x325   : > { %1177 = dma.done.wait (%p1467_p6), [#allocation12], 32  }
 0x326   : > { %1179 = vsyncadd (%p1467_p6), [#allocation12], 4294967264 }
 0x327 PF: > { %s25_s10 = sadd.s32 1, %s1202_s10   ;;  %s1574_s27 = smov %s1186_s28 }
 0x328   : > { %p22_p7 = scmp.ge.s32.totalorder %s25_s10, 4   ;;  %s1575_s28 = smov %s1190_s29 }
 0x329   : > { %s1576_s29 = smov %s1386_s11  ;;  %s1577_s30 = smov %s1198_s9 }
 0x32a   : > { %s1578_s9 = smov %s1580_s8  ;;  %24 = sbr.rel (!%p22_p7) target bundleno = 10 (0xa), region = 111 }
 0x331   :  { %760 = vsyncpa [#allocation5], 1 }
 0x332   :  { %762 = vsyncpa [#allocation5 + $0x1], 1 }
 0x333   :  { %763 = vsyncpa [#allocation8], 1 }
 0x334   :  { %764 = vsyncpa [#allocation6], 1 }
 0x335   :  { %766 = vsyncpa [#allocation6 + $0x1], 1 }
 0x336   :  { %767 = vsyncpa [#allocation12], 1 }

</bundles_post_ra>
